<compile_context>
chip_gen: v6e
topology: v6e:2x2x1
jax: 0.10.0
libtpu: 0.0.40
codegen_flags: <defaults>
</compile_context>

<pallas_src>
import jax
import jax.numpy as jnp
from jax.experimental import pallas as pl
from jax.experimental.pallas import tpu as pltpu


# ---------------------------------------------------------------------------
# Helpers
# ---------------------------------------------------------------------------
def _round_up(x: int, m: int) -> int:
    return (x + m - 1) // m * m


def _cdiv(a: int, b: int) -> int:
    return -(-a // b)


def _lane_pad(d: int) -> int:
    # v6e/v7x MXU is 256x256 -> prefer 256-aligned lane/contraction dims when
    # the dimension is already >128 (cheap); otherwise pad to the 128 minimum.
    return _round_up(d, 256) if d > 128 else _round_up(d, 128)


def _tpu_generation() -> str:
    try:
        kind = jax.devices()[0].device_kind.lower()
    except Exception:
        kind = ""
    for g in ("v5", "v6", "v7"):
        if g in kind:
            return g
    return "unknown"


def _gen_params():
    gen = _tpu_generation()
    if gen == "v6":
        # 128 MiB VMEM, largest flop/byte gap -> big row tiles.
        return dict(tm_target=1024, vmem_cap=100 << 20)
    if gen == "v5":
        # 128 MiB VMEM, lowest HBM BW -> TM=512 is past the roofline knee.
        return dict(tm_target=512, vmem_cap=96 << 20)
    # v7x has only 64 MiB physical VMEM per TC; also used for unknown chips.
    return dict(tm_target=512, vmem_cap=56 << 20)


# ---------------------------------------------------------------------------
# Pallas kernels
# ---------------------------------------------------------------------------
def _mlp_kernel_resident(x_ref, w1_ref, b1_ref, w2_ref, b2_ref, o_ref):
    """Weights fully resident in VMEM; one grid step per row tile."""
    h = jnp.dot(x_ref[...], w1_ref[...], preferred_element_type=jnp.float32)
    # NOTE: tanh-approx GELU (EUP); PyTorch nn.GELU defaults to exact erf.
    h = jax.nn.gelu(h + b1_ref[...].astype(jnp.float32), approximate=True)
    y = jnp.dot(h.astype(w2_ref.dtype), w2_ref[...],
                preferred_element_type=jnp.float32)
    o_ref[...] = (y + b2_ref[...].astype(jnp.float32)).astype(o_ref.dtype)


def _mlp_kernel_chunked(x_ref, w1_ref, b1_ref, w2_ref, b2_ref, o_ref, acc_ref):
    """grid = (row tiles, H_FF chunks); resident f32 accumulator over k."""
    k = pl.program_id(1)

    @pl.when(k == 0)
    def _():
        acc_ref[...] = jnp.zeros_like(acc_ref)

    h = jnp.dot(x_ref[...], w1_ref[...], preferred_element_type=jnp.float32)
    h = jax.nn.gelu(h + b1_ref[...].astype(jnp.float32), approximate=True)
    acc_ref[...] += jnp.dot(h.astype(w2_ref.dtype), w2_ref[...],
                            preferred_element_type=jnp.float32)

    @pl.when(k == pl.num_programs(1) - 1)
    def _():
        o_ref[...] = (acc_ref[...]
                      + b2_ref[...].astype(jnp.float32)).astype(o_ref.dtype)


# ---------------------------------------------------------------------------
# Forward wrapper
# ---------------------------------------------------------------------------
def _mlp_pallas_forward(x2d, w1, b1, w2, b2, force_chunked=False):
    M, H = x2d.shape
    F = w1.shape[1]
    out_dtype = x2d.dtype
    isz = jnp.dtype(x2d.dtype).itemsize
    sublane = 16 if isz < 4 else 8          # bf16 sublane packing wants 16

    H_p = _lane_pad(H)
    F_p = _lane_pad(F)

    gen = _gen_params()
    vmem_cap = gen["vmem_cap"]
    tm_target = gen["tm_target"]

    # ----- row tiling: minimise padding waste, keep >=2 tiles for 2 TCs -----
    def row_tiling(tm_tgt):
        n_tiles = max(1, _cdiv(M, tm_tgt))
        if n_tiles == 1 and M > sublane:
            n_tiles = 2
        tm = _round_up(_cdiv(M, n_tiles), sublane)
        return tm, tm * n_tiles, n_tiles

    # ----- VMEM budgets (double-buffered blocks + f32 intermediates) -----
    def resident_bytes(tm):
        return (2 * tm * H_p * isz                 # x tile
                + 2 * tm * H_p * isz               # out tile
                + 2 * (H_p * F_p + F_p) * isz      # W1 + b1 (budget 2 bufs)
                + 2 * (F_p * H_p + H_p) * isz      # W2 + b2
                + 2 * tm * F_p * 4                 # f32 hidden + GELU temps
                + (4 << 20))                       # headroom

    def chunked_bytes(tm, tk):
        return (2 * tm * H_p * isz                 # x tile
                + 2 * tm * H_p * isz               # out tile
                + 2 * (H_p * tk + tk) * isz        # W1 chunk + b1 chunk
                + 2 * (tk * H_p + H_p) * isz       # W2 chunk + b2
                + tm * H_p * 4                     # f32 accumulator scratch
                + 2 * tm * tk * 4                  # f32 hidden chunk + temps
                + (4 << 20))

    # H_FF chunk for the chunked path: largest of 512/256/128 dividing F_p.
    if F_p % 512 == 0:
        TK = 512
    elif F_p % 256 == 0:
        TK = 256
    else:
        TK = 128
    TK = min(TK, F_p)

    # ----- pick variant + row tile, shrinking TM until the budget fits -----
    candidates = []
    t = tm_target
    while t >= sublane:
        candidates.append(t)
        t //= 2

    mode = None
    if not force_chunked:
        for tgt in candidates:
            tm, m_p, n_tiles = row_tiling(tgt)
            need = resident_bytes(tm)
            if need <= vmem_cap:
                mode = "resident"
                break
    if mode is None:
        for tgt in candidates:
            tm, m_p, n_tiles = row_tiling(tgt)
            need = chunked_bytes(tm, TK)
            if need <= vmem_cap:
                mode = "chunked"
                break
        else:
            tm, m_p, n_tiles = row_tiling(sublane)
            need = chunked_bytes(tm, TK)
            mode = "chunked"

    vmem_limit = int(min(vmem_cap, max(need, 32 << 20)))

    # ----- padding (no-ops skipped; folded at compile time for jit consts) --
    def pad2(a, rows, cols):
        pr, pc = rows - a.shape[0], cols - a.shape[1]
        if pr == 0 and pc == 0:
            return a
        return jnp.pad(a, ((0, pr), (0, pc)))

    x_p = pad2(x2d, m_p, H_p)
    w1_p = pad2(w1, H_p, F_p)
    b1_p = pad2(jnp.reshape(b1, (1, F)), 1, F_p)
    w2_p = pad2(w2, F_p, H_p)
    b2_p = pad2(jnp.reshape(b2, (1, H)), 1, H_p)

    cost = pl.CostEstimate(
        flops=4 * m_p * H_p * F_p,                 # two matmuls
        transcendentals=m_p * F_p,                 # one tanh per hidden elem
        bytes_accessed=(2 * m_p * H_p + 2 * H_p * F_p + F_p + H_p) * isz)

    if mode == "resident":
        out_p = pl.pallas_call(
            _mlp_kernel_resident,
            out_shape=jax.ShapeDtypeStruct((m_p, H_p), out_dtype),
            grid_spec=pltpu.PrefetchScalarGridSpec(
                num_scalar_prefetch=0,
                grid=(m_p // tm,),
                in_specs=[
                    pl.BlockSpec((tm, H_p), lambda i: (i, 0)),   # x row tile
                    pl.BlockSpec((H_p, F_p), lambda i: (0, 0)),  # W1 resident
                    pl.BlockSpec((1, F_p), lambda i: (0, 0)),    # b1 resident
                    pl.BlockSpec((F_p, H_p), lambda i: (0, 0)),  # W2 resident
                    pl.BlockSpec((1, H_p), lambda i: (0, 0)),    # b2 resident
                ],
                out_specs=pl.BlockSpec((tm, H_p), lambda i: (i, 0)),
            ),
            compiler_params=pltpu.CompilerParams(
                dimension_semantics=("parallel",),
                vmem_limit_bytes=vmem_limit),
            cost_estimate=cost,
        )(x_p, w1_p, b1_p, w2_p, b2_p)
    else:
        out_p = pl.pallas_call(
            _mlp_kernel_chunked,
            out_shape=jax.ShapeDtypeStruct((m_p, H_p), out_dtype),
            grid_spec=pltpu.PrefetchScalarGridSpec(
                num_scalar_prefetch=0,
                grid=(m_p // tm, F_p // TK),
                in_specs=[
                    pl.BlockSpec((tm, H_p), lambda i, k: (i, 0)),  # x row tile
                    pl.BlockSpec((H_p, TK), lambda i, k: (0, k)),  # W1 chunk
                    pl.BlockSpec((1, TK), lambda i, k: (0, k)),    # b1 chunk
                    pl.BlockSpec((TK, H_p), lambda i, k: (k, 0)),  # W2 chunk
                    pl.BlockSpec((1, H_p), lambda i, k: (0, 0)),   # b2 resident
                ],
                out_specs=pl.BlockSpec((tm, H_p), lambda i, k: (i, 0)),
                scratch_shapes=[pltpu.VMEM((tm, H_p), jnp.float32)],
            ),
            compiler_params=pltpu.CompilerParams(
                dimension_semantics=("parallel", "arbitrary"),
                vmem_limit_bytes=vmem_limit),
            cost_estimate=cost,
        )(x_p, w1_p, b1_p, w2_p, b2_p)

    if m_p == M and H_p == H:
        return out_p
    return out_p[:M, :H]


# Plain-JAX forward of the same math (used only for the custom backward pass).
def _mlp_reference(x2d, w1, b1, w2, b2):
    h = jax.nn.gelu(
        jnp.dot(x2d, w1, preferred_element_type=jnp.float32)
        + jnp.reshape(b1, (1, -1)).astype(jnp.float32),
        approximate=True)
    y = (jnp.dot(h.astype(w2.dtype), w2, preferred_element_type=jnp.float32)
         + jnp.reshape(b2, (1, -1)).astype(jnp.float32))
    return y.astype(x2d.dtype)


# custom_vjp so that jax.checkpoint / grad never autodiff the pallas_call.
@jax.custom_vjp
def fused_mlp(x2d, w1, b1, w2, b2):
    return _mlp_pallas_forward(x2d, w1, b1, w2, b2)


def _fused_mlp_fwd(x2d, w1, b1, w2, b2):
    return _mlp_pallas_forward(x2d, w1, b1, w2, b2), (x2d, w1, b1, w2, b2)


def _fused_mlp_bwd(res, g):
    # TODO(synk): fused Pallas dx/dW1/db1/dW2/db2 kernels; the plain-JAX VJP
    # re-materialises the full [M, H_FF] hidden activation in HBM.
    _, vjp_fn = jax.vjp(_mlp_reference, *res)
    return vjp_fn(g)


fused_mlp.defvjp(_fused_mlp_fwd, _fused_mlp_bwd)


def mlp_pallas(x, w1, b1, w2, b2, compute_dtype=None):
    """x: [B, S, H] -> [B, S, H] via the fused Pallas MLP kernel.

    compute_dtype: optional storage/compute dtype (e.g. jnp.bfloat16) — the
    MXU on all TPU generations is bf16-native; f32 operands run multi-pass.
    """
    B, S, H = x.shape
    if compute_dtype is not None:
        x = x.astype(compute_dtype)
        w1 = w1.astype(compute_dtype)
        b1 = b1.astype(compute_dtype)
        w2 = w2.astype(compute_dtype)
        b2 = b2.astype(compute_dtype)
    y2d = fused_mlp(x.reshape(B * S, H), w1, b1, w2, b2)
    return y2d.reshape(B, S, H)


# ---------------------------------------------------------------------------
# CheckpointWrapper: JAX equivalent of the PyTorch module
# ---------------------------------------------------------------------------
class CheckpointWrapper:
    def __init__(self, module_fn, use_checkpointing=True):
        """
        Args:
            module_fn: callable implementing the wrapped module's forward.
            use_checkpointing: whether to apply jax.checkpoint (remat), the
                JAX analogue of torch.utils.checkpoint.checkpoint.

        NOTE: when the wrapped module is `fused_mlp` alone, its custom_vjp
        already stores only the primal inputs, so remat gives no memory
        benefit and merely re-runs the Pallas forward during backward.  In
        production wrap a *larger* block, or set use_checkpointing=False.
        """
        self.module_fn = module_fn
        self.use_checkpointing = use_checkpointing

    def __call__(self, *inputs, **kwargs):
        if self.use_checkpointing:
            def function_with_kwargs(*ins):
                return self.module_fn(*ins, **kwargs)
            # Forward values are identical; only backward memory behaviour
            # (recompute instead of stash) differs.
            return jax.checkpoint(function_with_kwargs)(*inputs)
        else:
            return self.module_fn(*inputs, **kwargs)


if __name__ == "__main__":
    HIGH = jax.lax.Precision.HIGHEST

    # --------------------------------------------------------------
    # Primary (small) demo shapes, as implied by the wrapped MLP block.
    # --------------------------------------------------------------
    B, S, H, H_FF = 2, 8, 32, 64
    keys = jax.random.split(jax.random.PRNGKey(0), 10)

    x = jax.random.normal(keys[0], (B, S, H), dtype=jnp.float32)
    w1 = jax.random.normal(keys[1], (H, H_FF), dtype=jnp.float32) * 0.02
    b1 = jax.random.normal(keys[2], (1, H_FF), dtype=jnp.float32) * 0.02
    w2 = jax.random.normal(keys[3], (H_FF, H), dtype=jnp.float32) * 0.02
    b2 = jax.random.normal(keys[4], (1, H), dtype=jnp.float32) * 0.02

    inner = lambda inp: mlp_pallas(inp, w1, b1, w2, b2)
    wrapped = CheckpointWrapper(inner, use_checkpointing=True)

    out = jax.jit(wrapped)(x)
    jax.block_until_ready(out)

    h_ref = jax.nn.gelu(
        jnp.dot(x.reshape(-1, H), w1, precision=HIGH) + b1, approximate=True)
    ref = (jnp.dot(h_ref, w2, precision=HIGH) + b2).reshape(B, S, H)
    assert out.shape == (B, S, H)
    assert jnp.allclose(out, ref, atol=1e-4, rtol=1e-4)

    # Gradients through jax.checkpoint + custom_vjp (Pallas fwd is re-run
    # during remat; backward uses the explicit VJP).
    g_pallas = jax.jit(jax.grad(lambda xx: jnp.sum(wrapped(xx))))(x)
    g_ref = jax.grad(
        lambda xx: jnp.sum(_mlp_reference(xx.reshape(-1, H), w1, b1, w2, b2)))(x)
    jax.block_until_ready(g_pallas)
    assert jnp.allclose(g_pallas, g_ref, atol=1e-4, rtol=1e-4)

    # --------------------------------------------------------------
    # bf16 storage-dtype path (production setting): loose tolerance.
    # --------------------------------------------------------------
    out_bf16 = jax.jit(
        lambda a: mlp_pallas(a, w1, b1, w2, b2, compute_dtype=jnp.bfloat16))(x)
    jax.block_until_ready(out_bf16)
    assert out_bf16.shape == (B, S, H)
    assert jnp.allclose(out_bf16.astype(jnp.float32), ref, atol=3e-2, rtol=3e-2)

    # --------------------------------------------------------------
    # Secondary check: shapes with multiple row tiles and a forced chunked
    # grid (2 H_FF chunks with accumulation) plus non-aligned rows (M=640).
    # --------------------------------------------------------------
    B2, S2, H2, F2 = 1, 640, 128, 1024
    x2 = jax.random.normal(keys[5], (B2, S2, H2), dtype=jnp.float32)
    w1b = jax.random.normal(keys[6], (H2, F2), dtype=jnp.float32) * 0.02
    b1b = jax.random.normal(keys[7], (1, F2), dtype=jnp.float32) * 0.02
    w2b = jax.random.normal(keys[8], (F2, H2), dtype=jnp.float32) * 0.02
    b2b = jax.random.normal(keys[9], (1, H2), dtype=jnp.float32) * 0.02

    h2 = jax.nn.gelu(
        jnp.dot(x2.reshape(-1, H2), w1b, precision=HIGH) + b1b, approximate=True)
    ref2 = (jnp.dot(h2, w2b, precision=HIGH) + b2b).reshape(B2, S2, H2)

    # resident-weights path (auto)
    out2 = jax.jit(lambda a: mlp_pallas(a, w1b, b1b, w2b, b2b))(x2)
    jax.block_until_ready(out2)
    assert jnp.allclose(out2, ref2, atol=1e-3, rtol=1e-3)

    # chunked path (forced) — exercises the k-axis accumulator kernel.
    out3 = jax.jit(
        lambda a: _mlp_pallas_forward(
            a.reshape(-1, H2), w1b, b1b, w2b, b2b, force_chunked=True
        ).reshape(B2, S2, H2))(x2)
    jax.block_until_ready(out3)
    assert jnp.allclose(out3, ref2, atol=1e-3, rtol=1e-3)

    print("KERNEL_OK")
</pallas_src>

<mosaic_0001>
module attributes {stable_mosaic.version = 11 : i64} {
  func.func @_mlp_kernel_resident(%arg0: i32, %arg1: memref<8x128xf32, #tpu.memory_space<vmem>>, %arg2: memref<128x128xf32, #tpu.memory_space<vmem>>, %arg3: memref<1x128xf32, #tpu.memory_space<vmem>>, %arg4: memref<128x128xf32, #tpu.memory_space<vmem>>, %arg5: memref<1x128xf32, #tpu.memory_space<vmem>>, %arg6: memref<8x128xf32, #tpu.memory_space<vmem>>) attributes {dimension_semantics = [#tpu.dimension_semantics<parallel>], iteration_bounds = array<i64: 2>, scalar_prefetch = 0 : i64, scratch_operands = 0 : i64, tpu.core_type = #tpu.core_type<tc>, window_params = [{transform_indices = @transform_0, window_bounds = array<i64: 8, 128>}, {pipeline_mode = #tpu.pipeline_mode<synchronous>, transform_indices = @transform_1, window_bounds = array<i64: 128, 128>}, {pipeline_mode = #tpu.pipeline_mode<synchronous>, transform_indices = @transform_2, window_bounds = array<i64: 1, 128>}, {pipeline_mode = #tpu.pipeline_mode<synchronous>, transform_indices = @transform_3, window_bounds = array<i64: 128, 128>}, {pipeline_mode = #tpu.pipeline_mode<synchronous>, transform_indices = @transform_4, window_bounds = array<i64: 1, 128>}, {transform_indices = @transform_5, window_bounds = array<i64: 8, 128>}]} {
    %c0 = arith.constant 0 : index
    %c0_0 = arith.constant 0 : index
    %0 = vector.load %arg1[%c0, %c0_0] : memref<8x128xf32, #tpu.memory_space<vmem>>, vector<8x128xf32>
    %c0_1 = arith.constant 0 : index
    %c0_2 = arith.constant 0 : index
    %1 = vector.load %arg2[%c0_1, %c0_2] : memref<128x128xf32, #tpu.memory_space<vmem>>, vector<128x128xf32>
    %cst = arith.constant dense<0.000000e+00> : vector<8x128xf32>
    %2 = tpu.matmul %0, %1, %cst {dimension_numbers = #tpu.dot_dimension_numbers<[1], [0], [0], [1], [0, 0, 1, 1], [], []>} : vector<8x128xf32>, vector<128x128xf32>, vector<8x128xf32> -> vector<8x128xf32>
    %c0_3 = arith.constant 0 : index
    %c0_4 = arith.constant 0 : index
    %3 = vector.load %arg3[%c0_3, %c0_4] : memref<1x128xf32, #tpu.memory_space<vmem>>, vector<1x128xf32>
    %4 = vector.broadcast %3 : vector<1x128xf32> to vector<8x128xf32>
    %5 = arith.addf %2, %4 : vector<8x128xf32>
    %6 = arith.mulf %5, %5 : vector<8x128xf32>
    %7 = arith.mulf %5, %6 : vector<8x128xf32>
    %cst_5 = arith.constant 4.471500e-02 : f32
    %8 = vector.broadcast %cst_5 : f32 to vector<8x128xf32>
    %9 = arith.mulf %8, %7 : vector<8x128xf32>
    %10 = arith.addf %5, %9 : vector<8x128xf32>
    %cst_6 = arith.constant 0.797884583 : f32
    %11 = vector.broadcast %cst_6 : f32 to vector<8x128xf32>
    %12 = arith.mulf %11, %10 : vector<8x128xf32>
    %13 = math.tanh %12 : vector<8x128xf32>
    %cst_7 = arith.constant 1.000000e+00 : f32
    %14 = vector.broadcast %cst_7 : f32 to vector<8x128xf32>
    %15 = arith.addf %14, %13 : vector<8x128xf32>
    %cst_8 = arith.constant 5.000000e-01 : f32
    %16 = vector.broadcast %cst_8 : f32 to vector<8x128xf32>
    %17 = arith.mulf %16, %15 : vector<8x128xf32>
    %18 = arith.mulf %5, %17 : vector<8x128xf32>
    %c0_9 = arith.constant 0 : index
    %c0_10 = arith.constant 0 : index
    %19 = vector.load %arg4[%c0_9, %c0_10] : memref<128x128xf32, #tpu.memory_space<vmem>>, vector<128x128xf32>
    %cst_11 = arith.constant dense<0.000000e+00> : vector<8x128xf32>
    %20 = tpu.matmul %18, %19, %cst_11 {dimension_numbers = #tpu.dot_dimension_numbers<[1], [0], [0], [1], [0, 0, 1, 1], [], []>} : vector<8x128xf32>, vector<128x128xf32>, vector<8x128xf32> -> vector<8x128xf32>
    %c0_12 = arith.constant 0 : index
    %c0_13 = arith.constant 0 : index
    %21 = vector.load %arg5[%c0_12, %c0_13] : memref<1x128xf32, #tpu.memory_space<vmem>>, vector<1x128xf32>
    %22 = vector.broadcast %21 : vector<1x128xf32> to vector<8x128xf32>
    %23 = arith.addf %20, %22 : vector<8x128xf32>
    %c0_14 = arith.constant 0 : index
    %c0_15 = arith.constant 0 : index
    %24 = vector.load %arg6[%c0_14, %c0_15] : memref<8x128xf32, #tpu.memory_space<vmem>>, vector<8x128xf32>
    tpu.vector_store %arg6[%c0_14, %c0_15], %23 {strides = array<i32>} : memref<8x128xf32, #tpu.memory_space<vmem>>, vector<8x128xf32>,
    return
  }
  func.func @transform_0(%arg0: i32) -> (i32, i32) {
    %c0_i32 = arith.constant 0 : i32
    %c0_i32_0 = arith.constant 0 : i32
    return %arg0, %c0_i32 : i32, i32
  }
  func.func @transform_1(%arg0: i32) -> (i32, i32) {
    %c0_i32 = arith.constant 0 : i32
    %c0_i32_0 = arith.constant 0 : i32
    %c0_i32_1 = arith.constant 0 : i32
    return %c0_i32, %c0_i32_0 : i32, i32
  }
  func.func @transform_2(%arg0: i32) -> (i32, i32) {
    %c0_i32 = arith.constant 0 : i32
    %c0_i32_0 = arith.constant 0 : i32
    %c0_i32_1 = arith.constant 0 : i32
    return %c0_i32, %c0_i32_0 : i32, i32
  }
  func.func @transform_3(%arg0: i32) -> (i32, i32) {
    %c0_i32 = arith.constant 0 : i32
    %c0_i32_0 = arith.constant 0 : i32
    %c0_i32_1 = arith.constant 0 : i32
    return %c0_i32, %c0_i32_0 : i32, i32
  }
  func.func @transform_4(%arg0: i32) -> (i32, i32) {
    %c0_i32 = arith.constant 0 : i32
    %c0_i32_0 = arith.constant 0 : i32
    %c0_i32_1 = arith.constant 0 : i32
    return %c0_i32, %c0_i32_0 : i32, i32
  }
  func.func @transform_5(%arg0: i32) -> (i32, i32) {
    %c0_i32 = arith.constant 0 : i32
    %c0_i32_0 = arith.constant 0 : i32
    return %arg0, %c0_i32 : i32, i32
  }
}

</mosaic_0001>

<bundles_post_ra>
// kernel: checkpoint.1
= control target key start
LH: loop header
LB: loop body
LE: loop exit
PB: predicated region body
PF: predicated region fallthrough
CT: control target
= control target key end

     0   :  { %10 = vsyncpa [#allocation3], 0  ;;  %s889_s0 = inlined_call_operand.vmem [shape: f32[16,128], index: 0, kind: input, shape index: {}]   ;;  %s890_s1 = inlined_call_operand.hbm [shape: f32[128,128], index: 1, kind: input, shape index: {}]   ;;  %s891_s2 = inlined_call_operand.vmem [shape: f32[1,128], index: 2, kind: input, shape index: {}]   ;;  %s892_s3 = inlined_call_operand.hbm [shape: f32[128,128], index: 3, kind: input, shape index: {}]   ;;  %s893_s4 = inlined_call_operand.vmem [shape: f32[1,128], index: 4, kind: input, shape index: {}]   ;;  %s894_s5 = inlined_call_operand.vmem [shape: f32[16,128], index: 5, kind: output, shape index: {}]  }
   0x1   :  { %11 = vsyncpa [#allocation5], 0  ;;  %s780_s18 = smov 0  }
   0x2 LB: > { %s786_s19 = sadd.s32 4294967295, %s742_s18   ;;  %p524_p0 = scmp.ge.s32.totalorder %s742_s18, 1  ;;  %s742_s18 = sphi %s780_s18, %s17_s18  }
   0x3   : > { %p158_p1 = scmp.lt.s32.totalorder %s742_s18, 3  ;;  %s744_s20 = smov [#allocation2]  }
   0x4   : > { %s170_s21 = sshll.u32 %s744_s20, 4  ;;  %p656_p3 = scmp.eq.s32.totalorder %s786_s19, 0  ;;  %s171_s21 = int_to_ptr.vmem [resolvable:$true] %s170_s21 }
   0x5   : > { %p790_p2 = pnand %p524_p0, %p158_p1  ;;  %s745_s23 = smov [#allocation4]  }
   0x6   : > { %s186_s24 = sshll.u32 %s745_s23, 4  ;;  %s687_s26 = scalar_lea.vmem %s171_s21, 2048  ;;  %s187_s24 = int_to_ptr.vmem [resolvable:$true] %s186_s24 }
   0x7   : > { %p649_p4 = pneg %p790_p2  ;;  %p688_p7 = scmp.ne.s32.totalorder %s171_s21, %s687_s26 }
   0x8   : > { %p695_p10 = scmp.lt.s32.totalorder %s171_s21, %s171_s21  ;;  %p696_p11 = scmp.lt.s32.totalorder %s687_s26, %s687_s26 }
   0x9   : > { %p799_p5 = pnand %p656_p3, %p649_p4 }
   0xa   : > { %p697_p12 = por %p696_p11, %p695_p10 }
   0xb   : > { %p678_p6 = pneg %p799_p5 }
   0xd   : > { %p690_p8 = pnand %p688_p7, %p678_p6 }
   0xf   : > { %p691_p9 = pneg %p690_p8 }
  0x11   : > { %p698_p13 = pnand %p697_p12, %p691_p9 }
  0x13   : > { %701 = shalt.err (!%p698_p13)
}
  0x14   : > { %s746_s27 = smov 128   ;;  %s747_s28 = smov 8  }
  0x15   : > { %652 = dma.hbm_to_vmem [thread:$0]  (!%p799_p5), %s890_s1, 2048, %s171_s21, [#allocation3], %s746_s27, %s746_s27, %s747_s28  }
  0x16   : > { %s713_s6 = scalar_lea.vmem %s187_s24, 2048  ;;  %p721_p7 = scmp.lt.s32.totalorder %s187_s24, %s187_s24 }
  0x17   : > { %p714_p0 = scmp.ne.s32.totalorder %s187_s24, %s713_s6  ;;  %p722_p8 = scmp.lt.s32.totalorder %s713_s6, %s713_s6 }
  0x19   : > { %p716_p1 = pnand %p714_p0, %p678_p6  ;;  %p723_p10 = por %p722_p8, %p721_p7 }
  0x1b   : > { %p717_p4 = pneg %p716_p1 }
  0x1d   : > { %p724_p9 = pnand %p723_p10, %p717_p4 }
  0x1f   : > { %727 = shalt.err (!%p724_p9)
}
  0x20   : > { %655 = dma.hbm_to_vmem [thread:$0]  (!%p799_p5), %s892_s3, 2048, %s187_s24, [#allocation5], %s746_s27, %s746_s27, %s747_s28  }
  0x21   : > { %212 = sbr.rel (%p790_p2) target bundleno = 496 (0x1f0), region = 40 }
  0x26   : > { %733 = dma.done.wait (%p656_p3), [#allocation3], 2048  }
  0x27   : > { %735 = vsyncadd (%p656_p3), [#allocation3], 4294965248 }
  0x28   : > { %737 = dma.done.wait (%p656_p3), [#allocation5], 2048  }
  0x29   : > { %739 = vsyncadd (%p656_p3), [#allocation5], 4294965248  ;;  %v748_v0 = vmov 0.0   ;;  %vm749_vm0 = vmmov 0   ;;  %v266_v1 = vld [vmem:[#allocation2 + $0x78] sm:$0xff]  ;;  %v265_v2 = vld [vmem:[#allocation2 + $0x70] sm:$0xff] }
  0x2a   : > { %571 = vmatprep.subr.mxu0 %v748_v0  ;;  %603 = vmatprep.mubr.msk.f32.mxu0 %vm749_vm0, %v748_v0  ;;  %v264_v3 = vld [vmem:[#allocation2 + $0x68] sm:$0xff]  ;;  %v263_v4 = vld [vmem:[#allocation2 + $0x60] sm:$0xff]  ;;  %v262_v5 = vld [vmem:[#allocation2 + $0x58] sm:$0xff]  ;;  %p242_p2 = scmp.lt.s32.totalorder %s786_s19, 1 }
  0x2b   : > { %606 = vmatprep.subr.mxu1 %v748_v0  ;;  %638 = vmatprep.mubr.msk.f32.mxu1 %vm749_vm0, %v748_v0  ;;  %v261_v6 = vld [vmem:[#allocation2 + $0x50] sm:$0xff]  ;;  %v260_v7 = vld [vmem:[#allocation2 + $0x48] sm:$0xff]  ;;  %v259_v8 = vld [vmem:[#allocation2 + $0x40] sm:$0xff] }
  0x2c   : > { %572 = vmatpush3.msra.mxu0 %v266_v1  ;;  %v258_v9 = vld [vmem:[#allocation2 + $0x38] sm:$0xff]  ;;  %v257_v10 = vld [vmem:[#allocation2 + $0x30] sm:$0xff]  ;;  %v256_v11 = vld [vmem:[#allocation2 + $0x28] sm:$0xff]  ;;  %s898_s19 = smov (!%p242_p2, %s786_s19), 1 }
  0x2d   : > { %573 = vmatprep.subr.mxu0 %v748_v0  ;;  %v255_v12 = vld [vmem:[#allocation2 + $0x20] sm:$0xff]  ;;  %v254_v13 = vld [vmem:[#allocation2 + $0x18] sm:$0xff]  ;;  %s531_s9 = sshll.u32 %s898_s19, 3  ;;  %v253_v14 = vld [vmem:[#allocation2 + $0x10] sm:$0xff] }
  0x2e   : > { %574 = vmatpush3.msra.mxu0 %v265_v2  ;;  %v252_v15 = vld [vmem:[#allocation2 + $0x8] sm:$0xff]  ;;  %s245_s12 = scalar_lea.vmem %s889_s0, %s531_s9  ;;  %v251_v16 = vld [vmem:[#allocation2] sm:$0xff]  ;;  %v368_v18 = vld [vmem:[#allocation4 + $0x78] sm:$0xff]  ;;  %s249_s21 = scalar_lea.vmem %s894_s5, %s531_s9 }
  0x2f   : > { %575 = vmatprep.subr.mxu0 %v748_v0  ;;  %v250_v17 = vld [vmem:[%s245_s12] sm:$0xff]  ;;  %607 = vmatpush3.msra.mxu1 %v368_v18  ;;  %v367_v19 = vld [vmem:[#allocation4 + $0x70] sm:$0xff]  ;;  %v366_v20 = vld [vmem:[#allocation4 + $0x68] sm:$0xff] }
  0x30   : > { %576 = vmatpush3.msra.mxu0 %v264_v3  ;;  %608 = vmatprep.subr.mxu1 %v748_v0  ;;  %v365_v21 = vld [vmem:[#allocation4 + $0x60] sm:$0xff]  ;;  %v364_v22 = vld [vmem:[#allocation4 + $0x58] sm:$0xff]  ;;  %v363_v23 = vld [vmem:[#allocation4 + $0x50] sm:$0xff] }
  0x31   : > { %577 = vmatprep.subr.mxu0 %v748_v0  ;;  %609 = vmatpush3.msra.mxu1 %v367_v19  ;;  %v362_v24 = vld [vmem:[#allocation4 + $0x48] sm:$0xff]  ;;  %v361_v25 = vld [vmem:[#allocation4 + $0x40] sm:$0xff]  ;;  %v360_v26 = vld [vmem:[#allocation4 + $0x38] sm:$0xff] }
  0x32   : > { %578 = vmatpush3.msra.mxu0 %v263_v4  ;;  %610 = vmatprep.subr.mxu1 %v748_v0  ;;  %v359_v27 = vld [vmem:[#allocation4 + $0x30] sm:$0xff]  ;;  %v358_v28 = vld [vmem:[#allocation4 + $0x28] sm:$0xff]  ;;  %v357_v29 = vld [vmem:[#allocation4 + $0x20] sm:$0xff] }
  0x33   : > { %579 = vmatprep.subr.mxu0 %v748_v0  ;;  %611 = vmatpush3.msra.mxu1 %v366_v20  ;;  %v356_v30 = vld [vmem:[#allocation4 + $0x18] sm:$0xff]  ;;  %v355_v31 = vld [vmem:[#allocation4 + $0x10] sm:$0xff]  ;;  %v354_v32 = vld [vmem:[#allocation4 + $0x8] sm:$0xff] }
  0x34   : > { %580 = vmatpush3.msra.mxu0 %v262_v5  ;;  %612 = vmatprep.subr.mxu1 %v748_v0  ;;  %v353_v33 = vld [vmem:[#allocation4] sm:$0xff] }
  0x35   : > { %581 = vmatprep.subr.mxu0 %v748_v0  ;;  %613 = vmatpush3.msra.mxu1 %v365_v21  ;;  %v533_v34 = vld [vmem:[%s891_s2] ss:$0 sm:$0xff] }
  0x36   : > { %582 = vmatpush3.msra.mxu0 %v261_v6  ;;  %614 = vmatprep.subr.mxu1 %v748_v0  ;;  %v534_v47 = vld [vmem:[%s893_s4] ss:$0 sm:$0xff] }
  0x37   : > { %583 = vmatprep.subr.mxu0 %v748_v0  ;;  %615 = vmatpush3.msra.mxu1 %v364_v22 }
  0x38   : > { %584 = vmatpush3.msra.mxu0 %v260_v7  ;;  %616 = vmatprep.subr.mxu1 %v748_v0 }
  0x39   : > { %585 = vmatprep.subr.mxu0 %v748_v0  ;;  %617 = vmatpush3.msra.mxu1 %v363_v23 }
  0x3a   : > { %586 = vmatpush3.msra.mxu0 %v259_v8  ;;  %618 = vmatprep.subr.mxu1 %v748_v0 }
  0x3b   : > { %587 = vmatprep.subr.mxu0 %v748_v0  ;;  %619 = vmatpush3.msra.mxu1 %v362_v24 }
  0x3c   : > { %588 = vmatpush3.msra.mxu0 %v258_v9  ;;  %620 = vmatprep.subr.mxu1 %v748_v0 }
  0x3d   : > { %589 = vmatprep.subr.mxu0 %v748_v0  ;;  %621 = vmatpush3.msra.mxu1 %v361_v25 }
  0x3e   : > { %590 = vmatpush3.msra.mxu0 %v257_v10  ;;  %622 = vmatprep.subr.mxu1 %v748_v0 }
  0x3f   : > { %591 = vmatprep.subr.mxu0 %v748_v0  ;;  %623 = vmatpush3.msra.mxu1 %v360_v26 }
  0x40   : > { %592 = vmatpush3.msra.mxu0 %v256_v11  ;;  %624 = vmatprep.subr.mxu1 %v748_v0 }
  0x41   : > { %593 = vmatprep.subr.mxu0 %v748_v0  ;;  %625 = vmatpush3.msra.mxu1 %v359_v27 }
  0x42   : > { %594 = vmatpush3.msra.mxu0 %v255_v12  ;;  %626 = vmatprep.subr.mxu1 %v748_v0 }
  0x43   : > { %595 = vmatprep.subr.mxu0 %v748_v0  ;;  %627 = vmatpush3.msra.mxu1 %v358_v28 }
  0x44   : > { %596 = vmatpush3.msra.mxu0 %v254_v13  ;;  %628 = vmatprep.subr.mxu1 %v748_v0 }
  0x45   : > { %597 = vmatprep.subr.mxu0 %v748_v0  ;;  %629 = vmatpush3.msra.mxu1 %v357_v29 }
  0x46   : > { %598 = vmatpush3.msra.mxu0 %v253_v14  ;;  %630 = vmatprep.subr.mxu1 %v748_v0 }
  0x47   : > { %599 = vmatprep.subr.mxu0 %v748_v0  ;;  %631 = vmatpush3.msra.mxu1 %v356_v30 }
  0x48   : > { %600 = vmatpush3.msra.mxu0 %v252_v15  ;;  %632 = vmatprep.subr.mxu1 %v748_v0 }
  0x49   : > { %601 = vmatprep.subr.mxu0 %v748_v0  ;;  %633 = vmatpush3.msra.mxu1 %v355_v31 }
  0x4a   : > { %602 = vmatpush3.msra.mxu0 %v251_v16  ;;  %634 = vmatprep.subr.mxu1 %v748_v0 }
  0x4b   : > { %604 = vmatmul.mubr.f32.vlgmr.msra.gmra.mxu0 %v250_v17  ;;  %635 = vmatpush3.msra.mxu1 %v354_v32 }
  0x4c   : > { %636 = vmatprep.subr.mxu1 %v748_v0 }
  0x4d   : > { %637 = vmatpush3.msra.mxu1 %v353_v33 }
 0x10b   : > { %v340_v35 = vpop.f32.mrf.mxu0 }
 0x10c   : > { %v341_v36 = vadd.f32 %v533_v34, %v340_v35 }
 0x10d   : > { %v605_v37 = vpop.f32.mrf.mxu0 }
 0x10e   : > { %v344_v38 = vmul.f32 %v341_v36, %v341_v36 }
 0x110   : > { %v345_v39 = vmul.f32 %v344_v38, %v341_v36 }
 0x112   : > { %v346_v40 = vmul.f32 0.044715, %v345_v39 }
 0x114   : > { %v347_v41 = vadd.f32 %v346_v40, %v341_v36 }
 0x116   : > { %v348_v42 = vmul.f32 0.7978846, %v347_v41 }
 0x118   : > { %674 = vtanh.f32 %v348_v42 }
 0x125   : > { %v675_v43 = vpop.eup %674 }
 0x126   : > { %v350_v44 = vadd.f32 1.0, %v675_v43 }
 0x128   : > { %v351_v45 = vmul.f32 0.5, %v350_v44 }
 0x12a   : > { %v352_v46 = vmul.f32 %v351_v45, %v341_v36 }
 0x12c   : > { %639 = vmatmul.mubr.f32.vlgmr.msra.gmra.mxu1 %v352_v46 }
 0x1ec   : > { %v442_v48 = vpop.f32.mrf.mxu1 }
 0x1ed   : > { %v443_v49 = vadd.f32 %v534_v47, %v442_v48 }
 0x1ee   : > { %v640_v50 = vpop.f32.mrf.mxu1 }
 0x1ef   : > { %446 = vst [vmem:[%s249_s21] sm:$0xff] %v443_v49 }
 0x1f0 PF: > { %s17_s18 = sadd.s32 1, %s742_s18  }
 0x1f1   : > { %p14_p3 = scmp.ge.s32.totalorder %s17_s18, 4  }
 0x1f3   :  { %16 = sbr.rel (!%p14_p3) target bundleno = 2 (0x2), region = 79 }
 0x1f8   :  { %466 = vsyncpa [#allocation3], 1 }
 0x1f9   :  { %468 = vsyncpa [#allocation3 + $0x1], 1 }
 0x1fa   :  { %469 = vsyncpa [#allocation5], 1 }

</bundles_post_ra>
